<compile_context>
chip_gen: v7x
topology: tpu7x:2x2x1
jax: 0.10.0
libtpu: 0.0.40
codegen_flags: <defaults>
</compile_context>

<pallas_src>
import jax
import jax.numpy as jnp
from jax.experimental import pallas as pl
from jax.experimental.pallas import tpu as pltpu

LANES = 128
TILE_ROWS = 8             # f32 sublane tile height
MAX_BLOCK_ROWS = 2048     # 2048x128 f32 = 1 MiB per input per pipeline buffer


def _make_loss_kernel(rows, block_rows, acc_rows, inner, num_blocks,
                      needs_mask, hard_labels):
    """Build the kernel with all static parameters closed over (Python ints)."""

    def fold(v):
        # Reduce a (block_rows, LANES) block to an (acc_rows, LANES) partial.
        # Leading-axis sums of (8,128) chunks are plain VPU vreg adds; the
        # cross-lane (XLU) reduction is deferred to the JAX wrapper.
        if acc_rows == TILE_ROWS:
            return jnp.sum(v.reshape(-1, TILE_ROWS, LANES), axis=0)
        return jnp.sum(v, axis=0, keepdims=True)   # tiny single-block case

    def kernel(logit_ref, tgt_ref, acc_ref):
        c = pl.program_id(0)        # parallel split (v7x two-TensorCore axis)
        b = pl.program_id(1)        # sequential blocks within the split

        @pl.when(b == 0)
        def _init():
            acc_ref[...] = jnp.zeros_like(acc_ref)

        x = logit_ref[...].astype(jnp.float32)
        t = tgt_ref[...].astype(jnp.float32)

        # Logit-space BCE: log(sigmoid(x)) = min(x,0) - log(1+exp(-|x|)),
        # log(1-sigmoid(x)) = log(sigmoid(x)) - x.  One exp + one log per
        # element; each log term clamped at -100 to match torch.nn.BCELoss.
        log_p = jnp.minimum(x, 0.0) - jnp.log(1.0 + jnp.exp(-jnp.abs(x)))
        log_p_c = jnp.maximum(log_p, -100.0)
        log_1mp_c = jnp.maximum(log_p - x, -100.0)
        if hard_labels:
            # Valid only for targets exactly in {-1, 0, 1}.
            bce = -jnp.where(t > 0.5, log_p_c, log_1mp_c)
        else:
            bce = -(t * log_p_c + (1.0 - t) * log_1mp_c)

        zeros = jnp.zeros_like(bce)
        ones = jnp.ones_like(bce)

        def accumulate(t_eff):
            # valid: t > -0.5 ; pos: t > 0.5 (pos implies valid).  neg stats
            # are derived as (valid - pos) in the wrapper, trimming the extra
            # compare / logical_and chain on the binding VALU slots.
            valid = t_eff > -0.5
            pos = t_eff > 0.5
            acc_ref[0, :, :] += fold(jnp.where(valid, bce, zeros))
            acc_ref[1, :, :] += fold(jnp.where(valid, ones, zeros))
            acc_ref[2, :, :] += fold(jnp.where(pos, bce, zeros))
            acc_ref[3, :, :] += fold(jnp.where(pos, ones, zeros))

        if not needs_mask:
            # Common path: every block is full -> no bounds logic at all.
            accumulate(t)
        else:
            gb = c * inner + b                   # global block index
            is_tail = gb >= num_blocks - 1       # partial last block / no-op

            @pl.when(gb < num_blocks - 1)
            def _bulk():
                accumulate(t)

            @pl.when(is_tail)
            def _tail():
                # Fold the row bound into t: out-of-range rows -> "ignore".
                # (where = select, so Inf/NaN from OOB garbage never leaks.)
                row_ids = (jax.lax.broadcasted_iota(jnp.int32, t.shape, 0)
                           + gb * block_rows)
                accumulate(jnp.where(row_ids < rows, t, -1.0))

    return kernel


def pallas_loss(output, target, hard_labels=False):
    """Equivalent of Loss().forward(output, target, use_hard_mining=False).

    hard_labels=True enables a cheaper BCE select, valid only when targets are
    exactly in {-1, 0, 1}; the default reproduces nn.BCELoss for soft targets.
    """
    out_flat = output.reshape(-1)
    tgt_flat = target.reshape(-1)
    n = out_flat.shape[0]

    # Lane tail (< 128 elems): pad targets with -1 (=> ignored).  Free for the
    # common detector shapes where n % 128 == 0.
    # TODO(synk): a fully copy-free ragged path needs 1-D blocks / manual DMA;
    #             jnp.pad costs one extra HBM pass only when n % 128 != 0.
    rem = n % LANES
    if rem:
        pad = LANES - rem
        out_flat = jnp.pad(out_flat, (0, pad))
        tgt_flat = jnp.pad(tgt_flat, (0, pad), constant_values=-1.0)

    rows = out_flat.shape[0] // LANES
    out2d = out_flat.reshape(rows, LANES)
    tgt2d = tgt_flat.reshape(rows, LANES)

    block_rows = rows if rows <= MAX_BLOCK_ROWS else MAX_BLOCK_ROWS
    num_blocks = pl.cdiv(rows, block_rows)
    # Split the block range across two cores (v7x megacore); on single-core
    # chips the two slices just run sequentially (negligible overhead).
    num_splits = 2 if num_blocks >= 2 else 1
    inner = pl.cdiv(num_blocks, num_splits)
    needs_mask = (rows % block_rows != 0) or (num_splits * inner != num_blocks)
    acc_rows = TILE_ROWS if block_rows % TILE_ROWS == 0 else 1

    def in_map(c, b):
        gb = jnp.minimum(c * inner + b, num_blocks - 1)  # clamp no-op blocks
        return (gb, 0)

    parts = pl.pallas_call(
        _make_loss_kernel(rows, block_rows, acc_rows, inner, num_blocks,
                          needs_mask, hard_labels),
        out_shape=jax.ShapeDtypeStruct((num_splits, 4, acc_rows, LANES),
                                       jnp.float32),
        grid_spec=pltpu.PrefetchScalarGridSpec(
            num_scalar_prefetch=0,
            grid=(num_splits, inner),
            in_specs=[
                pl.BlockSpec((block_rows, LANES), in_map),
                pl.BlockSpec((block_rows, LANES), in_map),
            ],
            out_specs=pl.BlockSpec((pl.Squeezed(), 4, acc_rows, LANES),
                                   lambda c, b: (c, 0, 0, 0)),
        ),
        compiler_params=pltpu.CompilerParams(
            dimension_semantics=("parallel", "arbitrary"),
            vmem_limit_bytes=32 * 1024 * 1024),
    )(out2d, tgt2d)

    # Combine raw per-split partials globally; divides happen exactly once.
    sums = jnp.sum(parts, axis=(0, 2, 3))   # [valid_sum, valid_cnt, pos_sum, pos_cnt]
    valid_sum, valid_cnt = sums[0], sums[1]
    pos_sum, pos_cnt = sums[2], sums[3]
    neg_sum = valid_sum - pos_sum
    neg_cnt = valid_cnt - pos_cnt
    pos_loss = jnp.where(pos_cnt > 0.0,
                         0.5 * pos_sum / jnp.maximum(pos_cnt, 1.0), 0.0)
    neg_loss = jnp.where(neg_cnt > 0.0,
                         0.5 * neg_sum / jnp.maximum(neg_cnt, 1.0), 0.0)
    return pos_loss + neg_loss


def _ref_loss(output, target):
    """Pure-JAX reference mirroring the PyTorch forward (no hard mining)."""
    p = jax.nn.sigmoid(output.reshape(-1).astype(jnp.float32))
    t = target.reshape(-1).astype(jnp.float32)
    valid = t > -0.5
    pos = jnp.logical_and(valid, t > 0.5)
    neg = jnp.logical_and(valid, t < 0.5)
    bce = -(t * jnp.maximum(jnp.log(p), -100.0)
            + (1.0 - t) * jnp.maximum(jnp.log(1.0 - p), -100.0))
    pos_cnt = jnp.sum(pos.astype(jnp.float32))
    neg_cnt = jnp.sum(neg.astype(jnp.float32))
    pos_loss = jnp.where(pos_cnt > 0.0,
                         0.5 * jnp.sum(jnp.where(pos, bce, 0.0))
                         / jnp.maximum(pos_cnt, 1.0), 0.0)
    neg_loss = jnp.where(neg_cnt > 0.0,
                         0.5 * jnp.sum(jnp.where(neg, bce, 0.0))
                         / jnp.maximum(neg_cnt, 1.0), 0.0)
    return pos_loss + neg_loss


if __name__ == "__main__":
    key = jax.random.PRNGKey(0)

    shapes = [
        (2, 4, 16, 16),    # headline detector-style logits: 1 block, no mask
        (3, 5, 7, 11),     # ragged: lane padding + non-multiple-of-8 rows
        (4, 4, 160, 208),  # 4160 rows: 2-way split, partial tail + no-op block
    ]
    for idx, shape in enumerate(shapes):
        k_out, k_tgt = jax.random.split(jax.random.fold_in(key, idx))
        output = jax.random.normal(k_out, shape, dtype=jnp.float32)
        # targets in {-1 (ignore), 0 (negative), 1 (positive)}
        target = (jax.random.randint(k_tgt, shape, 0, 3) - 1).astype(jnp.float32)

        ref = jax.block_until_ready(_ref_loss(output, target))
        loss = jax.block_until_ready(pallas_loss(output, target))
        assert jnp.allclose(loss, ref, rtol=1e-4, atol=1e-5), (shape, loss, ref)

        # Hard-label fast path (targets here are exactly {-1, 0, 1}).
        loss_h = jax.block_until_ready(
            pallas_loss(output, target, hard_labels=True))
        assert jnp.allclose(loss_h, ref, rtol=1e-4, atol=1e-5), (shape, loss_h, ref)

    # All targets ignored -> both count branches off, loss must be 0.
    shape = (2, 4, 16, 16)
    output = jax.random.normal(jax.random.fold_in(key, 99), shape, jnp.float32)
    target = jnp.full(shape, -1.0, dtype=jnp.float32)
    loss = jax.block_until_ready(pallas_loss(output, target))
    ref = jax.block_until_ready(_ref_loss(output, target))
    assert jnp.allclose(loss, ref, atol=1e-6), (loss, ref)

    print("KERNEL_OK")
</pallas_src>

<mosaic_0001>
module attributes {stable_mosaic.version = 11 : i64} {
  func.func @kernel(%arg0: i32, %arg1: i32, %arg2: memref<16x128xf32, #tpu.memory_space<vmem>>, %arg3: memref<16x128xf32, #tpu.memory_space<vmem>>, %arg4: memref<1x4x8x128xf32, #tpu.memory_space<vmem>>) attributes {dimension_semantics = [#tpu.dimension_semantics<parallel>, #tpu.dimension_semantics<arbitrary>], iteration_bounds = array<i64: 1, 1>, scalar_prefetch = 0 : i64, scratch_operands = 0 : i64, tpu.core_type = #tpu.core_type<tc>, window_params = [{transform_indices = @transform_0, window_bounds = array<i64: 16, 128>}, {transform_indices = @transform_1, window_bounds = array<i64: 16, 128>}, {transform_indices = @transform_2, window_bounds = array<i64: 1, 4, 8, 128>}]} {
    %c0_i32 = arith.constant 0 : i32
    %0 = arith.cmpi eq, %arg1, %c0_i32 : i32
    %1 = arith.extui %0 : i1 to i32
    %c0_i32_0 = arith.constant 0 : i32
    %2 = arith.cmpi ne, %1, %c0_i32_0 : i32
    scf.if %2 {
      %cst_47 = arith.constant 0.000000e+00 : f32
      %69 = vector.broadcast %cst_47 : f32 to vector<4x8x128xf32>
      %c0_48 = arith.constant 0 : index
      %c0_49 = arith.constant 0 : index
      %c0_50 = arith.constant 0 : index
      %c0_51 = arith.constant 0 : index
      %70 = vector.load %arg4[%c0_48, %c0_49, %c0_50, %c0_51] : memref<1x4x8x128xf32, #tpu.memory_space<vmem>>, vector<1x4x8x128xf32>
      %71 = vector.shape_cast %70 : vector<1x4x8x128xf32> to vector<4x8x128xf32>
      %72 = vector.shape_cast %69 : vector<4x8x128xf32> to vector<1x4x8x128xf32>
      tpu.vector_store %arg4[%c0_48, %c0_49, %c0_50, %c0_51], %72 {strides = array<i32>} : memref<1x4x8x128xf32, #tpu.memory_space<vmem>>, vector<1x4x8x128xf32>,
    } else {
    }
    %c0 = arith.constant 0 : index
    %c0_1 = arith.constant 0 : index
    %3 = vector.load %arg2[%c0, %c0_1] : memref<16x128xf32, #tpu.memory_space<vmem>>, vector<16x128xf32>
    %c0_2 = arith.constant 0 : index
    %c0_3 = arith.constant 0 : index
    %4 = vector.load %arg3[%c0_2, %c0_3] : memref<16x128xf32, #tpu.memory_space<vmem>>, vector<16x128xf32>
    %cst = arith.constant 0.000000e+00 : f32
    %5 = vector.broadcast %cst : f32 to vector<16x128xf32>
    %6 = arith.minimumf %3, %5 : vector<16x128xf32>
    %7 = math.absf %3 : vector<16x128xf32>
    %cst_4 = arith.constant 0.000000e+00 : f32
    %8 = vector.broadcast %cst_4 : f32 to vector<16x128xf32>
    %9 = arith.subf %8, %7 : vector<16x128xf32>
    %10 = math.exp %9 : vector<16x128xf32>
    %cst_5 = arith.constant 1.000000e+00 : f32
    %11 = vector.broadcast %cst_5 : f32 to vector<16x128xf32>
    %12 = arith.addf %11, %10 : vector<16x128xf32>
    %13 = math.log %12 : vector<16x128xf32>
    %14 = arith.subf %6, %13 : vector<16x128xf32>
    %cst_6 = arith.constant -1.000000e+02 : f32
    %15 = vector.broadcast %cst_6 : f32 to vector<16x128xf32>
    %16 = arith.maximumf %14, %15 : vector<16x128xf32>
    %17 = arith.subf %14, %3 : vector<16x128xf32>
    %cst_7 = arith.constant -1.000000e+02 : f32
    %18 = vector.broadcast %cst_7 : f32 to vector<16x128xf32>
    %19 = arith.maximumf %17, %18 : vector<16x128xf32>
    %20 = arith.mulf %4, %16 : vector<16x128xf32>
    %cst_8 = arith.constant 1.000000e+00 : f32
    %21 = vector.broadcast %cst_8 : f32 to vector<16x128xf32>
    %22 = arith.subf %21, %4 : vector<16x128xf32>
    %23 = arith.mulf %22, %19 : vector<16x128xf32>
    %24 = arith.addf %20, %23 : vector<16x128xf32>
    %cst_9 = arith.constant 0.000000e+00 : f32
    %25 = vector.broadcast %cst_9 : f32 to vector<16x128xf32>
    %26 = arith.subf %25, %24 : vector<16x128xf32>
    %cst_10 = arith.constant 0.000000e+00 : f32
    %27 = vector.broadcast %cst_10 : f32 to vector<16x128xf32>
    %cst_11 = arith.constant 1.000000e+00 : f32
    %28 = vector.broadcast %cst_11 : f32 to vector<16x128xf32>
    %cst_12 = arith.constant -5.000000e-01 : f32
    %29 = vector.broadcast %cst_12 : f32 to vector<16x128xf32>
    %30 = arith.cmpf ogt, %4, %29 : vector<16x128xf32>
    %cst_13 = arith.constant 5.000000e-01 : f32
    %31 = vector.broadcast %cst_13 : f32 to vector<16x128xf32>
    %32 = arith.cmpf ogt, %4, %31 : vector<16x128xf32>
    %c0_14 = arith.constant 0 : index
    %c0_15 = arith.constant 0 : index
    %c0_16 = arith.constant 0 : index
    %c0_17 = arith.constant 0 : index
    %33 = vector.load %arg4[%c0_14, %c0_15, %c0_16, %c0_17] : memref<1x4x8x128xf32, #tpu.memory_space<vmem>>, vector<1x1x8x128xf32>
    %34 = vector.shape_cast %33 : vector<1x1x8x128xf32> to vector<8x128xf32>
    %35 = arith.select %30, %26, %27 : vector<16x128xi1>, vector<16x128xf32>
    %36 = vector.shape_cast %35 : vector<16x128xf32> to vector<2x8x128xf32>
    %cst_18 = arith.constant dense<0.000000e+00> : vector<8x128xf32>
    %37 = vector.multi_reduction <add>, %36, %cst_18 [0] : vector<2x8x128xf32> to vector<8x128xf32>
    %38 = arith.addf %34, %37 : vector<8x128xf32>
    %c0_19 = arith.constant 0 : index
    %c0_20 = arith.constant 0 : index
    %c0_21 = arith.constant 0 : index
    %c0_22 = arith.constant 0 : index
    %39 = vector.load %arg4[%c0_19, %c0_20, %c0_21, %c0_22] : memref<1x4x8x128xf32, #tpu.memory_space<vmem>>, vector<1x1x8x128xf32>
    %40 = vector.shape_cast %39 : vector<1x1x8x128xf32> to vector<8x128xf32>
    %41 = vector.shape_cast %38 : vector<8x128xf32> to vector<1x1x8x128xf32>
    tpu.vector_store %arg4[%c0_19, %c0_20, %c0_21, %c0_22], %41 {strides = array<i32>} : memref<1x4x8x128xf32, #tpu.memory_space<vmem>>, vector<1x1x8x128xf32>,
    %c0_23 = arith.constant 0 : index
    %c1 = arith.constant 1 : index
    %c0_24 = arith.constant 0 : index
    %c0_25 = arith.constant 0 : index
    %42 = vector.load %arg4[%c0_23, %c1, %c0_24, %c0_25] : memref<1x4x8x128xf32, #tpu.memory_space<vmem>>, vector<1x1x8x128xf32>
    %43 = vector.shape_cast %42 : vector<1x1x8x128xf32> to vector<8x128xf32>
    %44 = arith.select %30, %28, %27 : vector<16x128xi1>, vector<16x128xf32>
    %45 = vector.shape_cast %44 : vector<16x128xf32> to vector<2x8x128xf32>
    %cst_26 = arith.constant dense<0.000000e+00> : vector<8x128xf32>
    %46 = vector.multi_reduction <add>, %45, %cst_26 [0] : vector<2x8x128xf32> to vector<8x128xf32>
    %47 = arith.addf %43, %46 : vector<8x128xf32>
    %c0_27 = arith.constant 0 : index
    %c1_28 = arith.constant 1 : index
    %c0_29 = arith.constant 0 : index
    %c0_30 = arith.constant 0 : index
    %48 = vector.load %arg4[%c0_27, %c1_28, %c0_29, %c0_30] : memref<1x4x8x128xf32, #tpu.memory_space<vmem>>, vector<1x1x8x128xf32>
    %49 = vector.shape_cast %48 : vector<1x1x8x128xf32> to vector<8x128xf32>
    %50 = vector.shape_cast %47 : vector<8x128xf32> to vector<1x1x8x128xf32>
    tpu.vector_store %arg4[%c0_27, %c1_28, %c0_29, %c0_30], %50 {strides = array<i32>} : memref<1x4x8x128xf32, #tpu.memory_space<vmem>>, vector<1x1x8x128xf32>,
    %c0_31 = arith.constant 0 : index
    %c2 = arith.constant 2 : index
    %c0_32 = arith.constant 0 : index
    %c0_33 = arith.constant 0 : index
    %51 = vector.load %arg4[%c0_31, %c2, %c0_32, %c0_33] : memref<1x4x8x128xf32, #tpu.memory_space<vmem>>, vector<1x1x8x128xf32>
    %52 = vector.shape_cast %51 : vector<1x1x8x128xf32> to vector<8x128xf32>
    %53 = arith.select %32, %26, %27 : vector<16x128xi1>, vector<16x128xf32>
    %54 = vector.shape_cast %53 : vector<16x128xf32> to vector<2x8x128xf32>
    %cst_34 = arith.constant dense<0.000000e+00> : vector<8x128xf32>
    %55 = vector.multi_reduction <add>, %54, %cst_34 [0] : vector<2x8x128xf32> to vector<8x128xf32>
    %56 = arith.addf %52, %55 : vector<8x128xf32>
    %c0_35 = arith.constant 0 : index
    %c2_36 = arith.constant 2 : index
    %c0_37 = arith.constant 0 : index
    %c0_38 = arith.constant 0 : index
    %57 = vector.load %arg4[%c0_35, %c2_36, %c0_37, %c0_38] : memref<1x4x8x128xf32, #tpu.memory_space<vmem>>, vector<1x1x8x128xf32>
    %58 = vector.shape_cast %57 : vector<1x1x8x128xf32> to vector<8x128xf32>
    %59 = vector.shape_cast %56 : vector<8x128xf32> to vector<1x1x8x128xf32>
    tpu.vector_store %arg4[%c0_35, %c2_36, %c0_37, %c0_38], %59 {strides = array<i32>} : memref<1x4x8x128xf32, #tpu.memory_space<vmem>>, vector<1x1x8x128xf32>,
    %c0_39 = arith.constant 0 : index
    %c3 = arith.constant 3 : index
    %c0_40 = arith.constant 0 : index
    %c0_41 = arith.constant 0 : index
    %60 = vector.load %arg4[%c0_39, %c3, %c0_40, %c0_41] : memref<1x4x8x128xf32, #tpu.memory_space<vmem>>, vector<1x1x8x128xf32>
    %61 = vector.shape_cast %60 : vector<1x1x8x128xf32> to vector<8x128xf32>
    %62 = arith.select %32, %28, %27 : vector<16x128xi1>, vector<16x128xf32>
    %63 = vector.shape_cast %62 : vector<16x128xf32> to vector<2x8x128xf32>
    %cst_42 = arith.constant dense<0.000000e+00> : vector<8x128xf32>
    %64 = vector.multi_reduction <add>, %63, %cst_42 [0] : vector<2x8x128xf32> to vector<8x128xf32>
    %65 = arith.addf %61, %64 : vector<8x128xf32>
    %c0_43 = arith.constant 0 : index
    %c3_44 = arith.constant 3 : index
    %c0_45 = arith.constant 0 : index
    %c0_46 = arith.constant 0 : index
    %66 = vector.load %arg4[%c0_43, %c3_44, %c0_45, %c0_46] : memref<1x4x8x128xf32, #tpu.memory_space<vmem>>, vector<1x1x8x128xf32>
    %67 = vector.shape_cast %66 : vector<1x1x8x128xf32> to vector<8x128xf32>
    %68 = vector.shape_cast %65 : vector<8x128xf32> to vector<1x1x8x128xf32>
    tpu.vector_store %arg4[%c0_43, %c3_44, %c0_45, %c0_46], %68 {strides = array<i32>} : memref<1x4x8x128xf32, #tpu.memory_space<vmem>>, vector<1x1x8x128xf32>,
    return
  }
  func.func @transform_0(%arg0: i32, %arg1: i32) -> (i32, i32) {
    %c1_i32 = arith.constant 1 : i32
    %0 = arith.muli %arg0, %c1_i32 : i32
    %1 = arith.addi %0, %arg1 : i32
    %c0_i32 = arith.constant 0 : i32
    %2 = arith.minsi %1, %c0_i32 : i32
    %c0_i32_0 = arith.constant 0 : i32
    %c0_i32_1 = arith.constant 0 : i32
    return %2, %c0_i32_0 : i32, i32
  }
  func.func @transform_1(%arg0: i32, %arg1: i32) -> (i32, i32) {
    %c1_i32 = arith.constant 1 : i32
    %0 = arith.muli %arg0, %c1_i32 : i32
    %1 = arith.addi %0, %arg1 : i32
    %c0_i32 = arith.constant 0 : i32
    %2 = arith.minsi %1, %c0_i32 : i32
    %c0_i32_0 = arith.constant 0 : i32
    %c0_i32_1 = arith.constant 0 : i32
    return %2, %c0_i32_0 : i32, i32
  }
  func.func @transform_2(%arg0: i32, %arg1: i32) -> (i32, i32, i32, i32) {
    %c0_i32 = arith.constant 0 : i32
    %c0_i32_0 = arith.constant 0 : i32
    %c0_i32_1 = arith.constant 0 : i32
    %c0_i32_2 = arith.constant 0 : i32
    return %arg0, %c0_i32, %c0_i32_0, %c0_i32_1 : i32, i32, i32, i32
  }
}

</mosaic_0001>

<bundles_post_ra>
// kernel: tpu_custom_call.1
= control target key start
LH: loop header
LB: loop body
LE: loop exit
PB: predicated region body
PF: predicated region fallthrough
CT: control target
= control target key end

     0   :  { %7 = vsyncpa [#allocation3], 0  ;;  %s319_s0 = inlined_call_operand.hbm [shape: f32[16,128], index: 0, kind: input, shape index: {}]   ;;  %s320_s1 = inlined_call_operand.hbm [shape: f32[16,128], index: 1, kind: input, shape index: {}]   ;;  %s321_s2 = inlined_call_operand.hbm [shape: f32[1,4,8,128], index: 2, kind: output, shape index: {}]  }
   0x1   :  { %8 = vsyncpa [#allocation6], 0 }
   0x2   :  { %9 = vsyncpa [#allocation4], 0  ;;  %s245_s9 = smov [#allocation2]   ;;  %s173_s13 = scalar_lea.hbm %s319_s0, 256 }
   0x3   :  { %s21_s10 = sshll.u32 %s245_s9, 4  ;;  %p174_p0 = scmp.ne.s32.totalorder %s319_s0, %s173_s13  ;;  %s22_s10 = int_to_ptr.vmem [resolvable:$true] %s21_s10 }
   0x4   :  { %p177_p1 = scmp.lt.u32.totalorder %s173_s13, %s319_s0 }
   0x6   :  { %p179_p2 = pnand %p177_p1, %p174_p0 }
   0x8   :  { %182 = shalt.err (!%p179_p2)
}
   0x9   :  { %s183_s18 = scalar_lea.vmem %s22_s10, 256  ;;  %p188_p4 = scmp.lt.s32.totalorder %s22_s10, %s22_s10 }
   0xa   :  { %p184_p3 = scmp.ne.s32.totalorder %s22_s10, %s183_s18  ;;  %p189_p5 = scmp.lt.s32.totalorder %s183_s18, %s183_s18 }
   0xc   :  { %p190_p6 = por %p189_p5, %p188_p4 }
   0xe   :  { %p191_p7 = pnand %p190_p6, %p184_p3 }
  0x10   :  { %194 = shalt.err (!%p191_p7)
}
  0x11   :  { %s246_s19 = smov 128   ;;  %s247_s20 = smov 8  }
  0x12   :  { %27 = dma.hbm_to_vmem [thread:$0]  %s319_s0, 256, %s22_s10, [#allocation3], %s246_s19, %s246_s19, %s247_s20  }
  0x13   :  { %s248_s23 = smov [#allocation5]   ;;  %s195_s27 = scalar_lea.hbm %s320_s1, 256 }
  0x14   :  { %s39_s24 = sshll.u32 %s248_s23, 4  ;;  %p196_p8 = scmp.ne.s32.totalorder %s320_s1, %s195_s27  ;;  %s40_s24 = int_to_ptr.vmem [resolvable:$true] %s39_s24 }
  0x15   :  { %p199_p9 = scmp.lt.u32.totalorder %s195_s27, %s320_s1 }
  0x17   :  { %p201_p10 = pnand %p199_p9, %p196_p8 }
  0x19   :  { %204 = shalt.err (!%p201_p10)
}
  0x1a   :  { %s205_s4 = scalar_lea.vmem %s40_s24, 256  ;;  %p210_p12 = scmp.lt.s32.totalorder %s40_s24, %s40_s24 }
  0x1b   :  { %p206_p11 = scmp.ne.s32.totalorder %s40_s24, %s205_s4  ;;  %p211_p13 = scmp.lt.s32.totalorder %s205_s4, %s205_s4 }
  0x1d   :  { %p212_p0 = por %p211_p13, %p210_p12 }
  0x1f   :  { %p213_p1 = pnand %p212_p0, %p206_p11 }
  0x21   :  { %216 = shalt.err (!%p213_p1)
}
  0x22   :  { %45 = dma.hbm_to_vmem [thread:$0]  %s320_s1, 256, %s40_s24, [#allocation6], %s246_s19, %s246_s19, %s247_s20  }
  0x23   :  { %239 = dma.done.wait [#allocation3], 256  }
  0x24   :  { %240 = vsyncadd [#allocation3], 4294967040 }
  0x25   :  { %241 = dma.done.wait [#allocation6], 256  }
  0x26   :  { %242 = vsyncadd [#allocation6], 4294967040  ;;  %v68_v0 = vld [vmem:[#allocation2] sm:$0xff]  ;;  %v69_v1 = vld [vmem:[#allocation2 + $0x8] sm:$0xff]  ;;  %v249_v7 = vmov 0.0   ;;  %s250_s1 = smov [#allocation7]  }
  0x27   :  { %v70_v2 = vld [vmem:[#allocation5] sm:$0xff]  ;;  %v71_v3 = vld [vmem:[#allocation5 + $0x8] sm:$0xff]  ;;  %v74_v4 = vand.u32 2147483647, %v68_v0  ;;  %v75_v5 = vand.u32 2147483647, %v69_v1 }
  0x28   :  { %vm106_vm0 = vcmp.gt.f32.partialorder %v70_v2, -0.5  ;;  %vm107_vm1 = vcmp.gt.f32.partialorder %v71_v3, -0.5  ;;  %vm108_vm2 = vcmp.gt.f32.partialorder %v70_v2, 0.5  ;;  %vm109_vm3 = vcmp.gt.f32.partialorder %v71_v3, 0.5  ;;  %s142_s6 = sshll.u32 %s250_s1, 4  ;;  %s143_s6 = int_to_ptr.vmem [resolvable:$true] %s142_s6 }
  0x29   :  { %v76_v6 = vsub.f32 0.0, %v74_v4  ;;  %v118_v8 = vsel %vm106_vm0, 1.0, %v249_v7  ;;  %v119_v9 = vsel %vm107_vm1, 1.0, %v249_v7  ;;  %v77_v10 = vsub.f32 0.0, %v75_v5  ;;  %s217_s7 = scalar_lea.vmem %s143_s6, 512  ;;  %p222_p3 = scmp.lt.s32.totalorder %s143_s6, %s143_s6 }
  0x2a   :  { %v120_v11 = vadd.f32 %v119_v9, %v118_v8  ;;  %v132_v12 = vsel %vm108_vm2, 1.0, %v249_v7  ;;  %v133_v14 = vsel %vm109_vm3, 1.0, %v249_v7  ;;  %v72_v21 = vmin.f32 %v68_v0, 0.0  ;;  %p218_p2 = scmp.ne.s32.totalorder %s143_s6, %s217_s7  ;;  %p223_p4 = scmp.lt.s32.totalorder %s217_s7, %s217_s7 }
  0x2b   :  { %v78_v13 = vmul.f32 1.442695, %v76_v6  ;;  %v80_v15 = vmul.f32 1.442695, %v77_v10  ;;  %v134_v16 = vadd.f32 %v133_v14, %v132_v12  ;;  %v73_v23 = vmin.f32 %v69_v1, 0.0 }
  0x2c   :  { %122 = vst [vmem:[#allocation7 + $0x8] sm:$0xff] %v120_v11  ;;  %v98_v31 = vsub.f32 1.0, %v70_v2  ;;  %v99_v34 = vsub.f32 1.0, %v71_v3  ;;  %p224_p5 = por %p223_p4, %p222_p3 }
  0x2d   :  { %165 = vpow2.f32 %v78_v13  ;;  %136 = vst [vmem:[#allocation7 + $0x18] sm:$0xff] %v134_v16 }
  0x2e   :  { %167 = vpow2.f32 %v80_v15  ;;  %p225_p6 = pnand %p224_p5, %p218_p2 }
  0x37   :  { %v166_v17 = vpop.eup %165 }
  0x38   :  { %v168_v18 = vpop.eup %167  ;;  %v82_v19 = vadd.f32 1.0, %v166_v17 }
  0x39   :  { %v83_v20 = vadd.f32 1.0, %v168_v18 }
  0x3a   :  { %169 = vlog2.f32 %v82_v19 }
  0x3b   :  { %171 = vlog2.f32 %v83_v20 }
  0x44   :  { %v170_v22 = vpop.eup %169 }
  0x45   :  { %v172_v24 = vpop.eup %171  ;;  %v85_v25 = vmul.f32 0.6931472, %v170_v22 }
  0x46   :  { %v87_v26 = vmul.f32 0.6931472, %v172_v24 }
  0x47   :  { %v88_v27 = vsub.f32 %v72_v21, %v85_v25 }
  0x48   :  { %v89_v28 = vsub.f32 %v73_v23, %v87_v26 }
  0x49   :  { %v90_v29 = vmax.f32 %v88_v27, -100.0  ;;  %v92_v30 = vsub.f32 %v88_v27, %v68_v0 }
  0x4a   :  { %v91_v32 = vmax.f32 %v89_v28, -100.0  ;;  %v93_v33 = vsub.f32 %v89_v28, %v69_v1 }
  0x4b   :  { %v94_v35 = vmax.f32 %v92_v30, -100.0  ;;  %v96_v36 = vmul.f32 %v90_v29, %v70_v2 }
  0x4c   :  { %v95_v37 = vmax.f32 %v93_v33, -100.0  ;;  %v97_v38 = vmul.f32 %v91_v32, %v71_v3 }
  0x4d   :  { %v100_v39 = vmul.f32 %v98_v31, %v94_v35 }
  0x4e   :  { %v101_v40 = vmul.f32 %v99_v34, %v95_v37 }
  0x4f   :  { %v102_v41 = vadd.f32 %v100_v39, %v96_v36 }
  0x50   :  { %v103_v42 = vadd.f32 %v101_v40, %v97_v38 }
  0x51   :  { %v104_v43 = vsub.f32 0.0, %v102_v41 }
  0x52   :  { %v105_v44 = vsub.f32 0.0, %v103_v42 }
  0x53   :  { %v111_v45 = vsel %vm106_vm0, %v104_v43, 0.0  ;;  %v125_v46 = vsel %vm108_vm2, %v104_v43, 0.0 }
  0x54   :  { %v112_v47 = vsel %vm107_vm1, %v105_v44, 0.0  ;;  %v126_v48 = vsel %vm109_vm3, %v105_v44, 0.0 }
  0x55   :  { %v113_v49 = vadd.f32 %v112_v47, %v111_v45  ;;  %v127_v50 = vadd.f32 %v126_v48, %v125_v46 }
  0x57   :  { %115 = vst [vmem:[#allocation7] sm:$0xff] %v113_v49  ;;  %129 = vst [vmem:[#allocation7 + $0x10] sm:$0xff] %v127_v50 }
  0x58   :  { %228 = shalt.err (!%p225_p6)
}
  0x59   :  { %s229_s10 = scalar_lea.hbm %s321_s2, 512 }
  0x5a   :  { %p230_p7 = scmp.ne.s32.totalorder %s321_s2, %s229_s10  ;;  %p233_p8 = scmp.lt.u32.totalorder %s229_s10, %s321_s2 }
  0x5c   :  { %p235_p9 = pnand %p233_p8, %p230_p7 }
  0x5e   :  { %238 = shalt.err (!%p235_p9)
}
  0x5f   :  { %148 = dma.vmem_to_hbm [thread:$0]  %s143_s6, 512, %s321_s2, [#allocation4], %s246_s19, %s246_s19, %s247_s20  }
  0x60   :  { %243 = dma.done.wait [#allocation4], 512  }
  0x61   :  { %244 = vsyncadd [#allocation4], 4294966784 }
  0x62   :  { %152 = vsyncpa [#allocation3], 1 }
  0x63   :  { %153 = vsyncpa [#allocation6], 1 }
  0x64   :  { %154 = vsyncpa [#allocation4], 1 }

</bundles_post_ra>
